<compile_context>
chip_gen: v7x
topology: tpu7x:2x2x1
jax: 0.10.0
libtpu: 0.0.40
codegen_flags: <defaults>
</compile_context>

<pallas_src>
import jax
import jax.numpy as jnp
from jax.experimental import pallas as pl
from jax.experimental.pallas import tpu as pltpu


def _round_up(n: int, m: int) -> int:
    return (n + m - 1) // m * m


def _vmem_capacity_bytes() -> int:
    try:
        info = pltpu.get_tpu_info()
        cap = getattr(info, "vmem_capacity_bytes", None)
        if cap:
            return int(cap)
    except Exception:
        pass
    return 64 << 20  # conservative fallback (v7x-sized VMEM)


def _vmem_estimate(tm, tv, v_pad, E, x_bytes, w_bytes, o_bytes, out_bufs):
    """Rough VMEM footprint of one pipelined configuration."""
    return (2 * tm * E * x_bytes              # activation tile (double buffered)
            + 2 * E * tv * w_bytes            # (E, tv) weight tile (double buffered)
            + 2 * 8 * tv * 4                  # bias tile, sublane padded
            + out_bufs * tm * v_pad * o_bytes  # V-resident output block
            + 2 * tm * 128 * 4)               # m / l scratch, lane padded


def _pick_tiles(M, V, E, x_bytes, w_bytes, o_bytes, budget, force_out_buffers=None):
    """Pick (tm, tv, V_pad, out_buffers).

    tm is maximized first (weight re-streaming ~ M/tm dominates HBM traffic
    at real vocab sizes), then the largest tv; the output block is dropped to
    a single buffer only when double-buffering it would not fit (v7x, 64 MiB
    VMEM).  Keeps >= 2 row tiles when possible so the 'parallel' row axis can
    be split across TensorCores (v7x has 2 TCs per chip).
    """
    M8 = _round_up(max(M, 1), 8)
    V128 = _round_up(max(V, 1), 128)
    tm_cands = sorted({min(t, M8) for t in (512, 256, 128, 64, 32, 16, 8)},
                      reverse=True)
    multi = [t for t in tm_cands if (M + t - 1) // t >= 2]
    if multi:
        tm_cands = multi
    tv_cands = sorted({min(t, V128) for t in (2048, 1024, 512, 256, 128)},
                      reverse=True)
    buf_cands = (force_out_buffers,) if force_out_buffers is not None else (2, 1)

    for tm in tm_cands:
        for tv in tv_cands:
            v_pad = _round_up(V, tv)
            for nbuf in buf_cands:
                est = _vmem_estimate(tm, tv, v_pad, E, x_bytes, w_bytes,
                                     o_bytes, nbuf)
                if est <= budget:
                    return tm, tv, v_pad, nbuf
    raise ValueError(
        "mlm_head: no (tm, tv) tiling fits the VMEM budget "
        f"({budget} bytes) for M={M}, V={V}, E={E}, out_bytes={o_bytes}. "
        "Use a narrower out_dtype (e.g. bfloat16).")


def _mlm_head_kernel(x_ref, w_ref, b_ref, o_ref, m_ref, l_ref):
    """One (row-tile, vocab-tile) step of Linear + online log-softmax.

    x_ref: (tm, E)        activations (compute dtype)
    w_ref: (E, tv)        pre-transposed weight columns for this vocab tile
    b_ref: (1, tv)        bias slice (f32)
    o_ref: (tm, V_pad)    output block, resident across the vocab grid axis
    m_ref, l_ref: (tm,1)  running row-max / rescaled sum-exp (f32 scratch)
    """
    k = pl.program_id(1)
    nk = pl.num_programs(1)
    tv = w_ref.shape[1]

    @pl.when(k == 0)
    def _init():
        m_ref[...] = jnp.full(m_ref.shape, -jnp.inf, dtype=m_ref.dtype)
        l_ref[...] = jnp.zeros(l_ref.shape, dtype=l_ref.dtype)

    # (tm, tv) logits tile on the MXU.  The weight arrives already (E, V)
    # oriented, so this is a plain contraction -- no per-step XLU transpose.
    # f32 accumulation regardless of the (bf16) MXU input dtype.
    logits = jnp.dot(x_ref[...], w_ref[...],
                     preferred_element_type=jnp.float32) + b_ref[...]

    # Online logsumexp update across the vocab tiles (all f32).
    m_prev = m_ref[...]
    m_new = jnp.maximum(m_prev, jnp.max(logits, axis=-1, keepdims=True))
    l_ref[...] = (jnp.exp(m_prev - m_new) * l_ref[...]
                  + jnp.sum(jnp.exp(logits - m_new), axis=-1, keepdims=True))
    m_ref[...] = m_new

    # Stash the raw logits into the V-resident output block.
    start = pl.multiple_of(k * tv, tv)
    o_ref[:, pl.ds(start, tv)] = logits.astype(o_ref.dtype)

    # Last vocab tile: subtract the global logsumexp directly in out_dtype
    # (lean epilogue -- no f32 up/down-cast round-trip over the whole block).
    @pl.when(k == nk - 1)
    def _finalize():
        lse = m_ref[...] + jnp.log(l_ref[...])
        o_ref[...] = o_ref[...] - lse.astype(o_ref.dtype)


def _out_block_spec(tm, v_pad, out_buffers):
    idx = lambda i, k: (i, 0)
    if out_buffers == 2:
        return pl.BlockSpec((tm, v_pad), idx)
    try:
        # Single-buffer the V-resident output block (reclaims tm*V_pad bytes
        # of VMEM on tight-VMEM parts; writeback stall per row tile is small
        # next to the per-row-tile compute).
        return pl.BlockSpec((tm, v_pad), idx, pipeline_mode=pl.Buffered(1))
    except TypeError:
        # pipeline_mode not supported by this JAX version -> default buffering.
        return pl.BlockSpec((tm, v_pad), idx)


def mlm_head(x, weight, bias, *, out_dtype=jnp.bfloat16,
             compute_dtype=jnp.bfloat16, out_buffers=None):
    """MLMHead forward: log_softmax(x[:, 1:, :] @ weight.T + bias, axis=-1).

    x: (B, S, E); weight: (V, E); bias: (V,).  Returns (B, S-1, V) in
    `out_dtype`.  `compute_dtype` is the MXU input dtype (bf16 default; the
    accumulation and all softmax math are f32 either way).  `out_buffers`
    (None/1/2) forces the buffering of the V-resident output block.
    """
    B, S, E = x.shape
    V = weight.shape[0]
    out_dtype = jnp.dtype(out_dtype)
    compute_dtype = jnp.dtype(x.dtype if compute_dtype is None else compute_dtype)

    # Drop the [CLS] position and flatten rows.  (The +1 offset cannot be
    # expressed as a rectangular block of (B, S, E) once row tiles cross
    # batch boundaries, so this small activation copy is materialized; the
    # kernel's HBM traffic is dominated by the weight / output streams.)
    M = B * (S - 1)
    x2d = x[:, 1:, :].reshape(M, E).astype(compute_dtype)
    # One-time (V, E) -> (E, V) transpose so the kernel never transposes.
    w_t = jnp.transpose(weight).astype(compute_dtype)
    bias = bias.astype(jnp.float32)

    x_bytes = jnp.dtype(compute_dtype).itemsize
    o_bytes = out_dtype.itemsize
    vmem_cap = _vmem_capacity_bytes()
    vmem_limit = int(vmem_cap * 0.85)      # leave Mosaic scratch headroom
    tile_budget = vmem_limit - (4 << 20)   # align the tile budget with it
    tm, tv, V_pad, nbuf = _pick_tiles(M, V, E, x_bytes, x_bytes, o_bytes,
                                      tile_budget, out_buffers)

    # Pad rows / vocab up to the tile grid.  Padded vocab columns get a very
    # negative bias so they contribute nothing to the softmax normalizer
    # (representable in bf16/f32; they are sliced off before returning).
    M_pad = _round_up(M, tm)
    if M_pad != M:
        x2d = jnp.pad(x2d, ((0, M_pad - M), (0, 0)))
    if V_pad != V:
        w_t = jnp.pad(w_t, ((0, 0), (0, V_pad - V)))
        bias = jnp.pad(bias, (0, V_pad - V), constant_values=-1e30)
    b2d = bias.reshape(1, V_pad)

    grid = (M_pad // tm, V_pad // tv)

    out_full = pl.pallas_call(
        _mlm_head_kernel,
        out_shape=jax.ShapeDtypeStruct((M_pad, V_pad), out_dtype),
        grid_spec=pltpu.PrefetchScalarGridSpec(
            num_scalar_prefetch=0,
            grid=grid,
            in_specs=[
                pl.BlockSpec((tm, E), lambda i, k: (i, 0)),   # activations
                pl.BlockSpec((E, tv), lambda i, k: (0, k)),   # weight columns
                pl.BlockSpec((1, tv), lambda i, k: (0, k)),   # bias slice
            ],
            # Output block is resident across the vocab ("arbitrary") axis.
            out_specs=_out_block_spec(tm, V_pad, nbuf),
            scratch_shapes=[
                pltpu.VMEM((tm, 1), jnp.float32),   # running row max
                pltpu.VMEM((tm, 1), jnp.float32),   # running sum-exp
            ],
        ),
        compiler_params=pltpu.CompilerParams(
            dimension_semantics=("parallel", "arbitrary"),
            vmem_limit_bytes=vmem_limit,
        ),
    )(x2d, w_t, b2d)

    return out_full[:M, :V].reshape(B, S - 1, V)


def mlm_head_ref(x, weight, bias):
    logits = jnp.einsum("bse,ve->bsv", x[:, 1:, :].astype(jnp.float32),
                        weight.astype(jnp.float32)) + bias.astype(jnp.float32)
    return jax.nn.log_softmax(logits, axis=-1)


if __name__ == "__main__":
    key = jax.random.PRNGKey(0)
    kx, kw, kb = jax.random.split(key, 3)

    # Small shapes consistent with the module: batch=2, seq=9 (8 kept tokens),
    # hidden=32, vocab=128.
    B, S, E, V = 2, 9, 32, 128
    x = jax.random.normal(kx, (B, S, E), dtype=jnp.float32)
    bound = 1.0 / (E ** 0.5)
    weight = jax.random.uniform(kw, (V, E), minval=-bound, maxval=bound,
                                dtype=jnp.float32)
    bias = jax.random.uniform(kb, (V,), minval=-bound, maxval=bound,
                              dtype=jnp.float32)
    ref = mlm_head_ref(x, weight, bias)

    # 1) f32 compute / f32 output: tight check against the reference.
    out = jax.block_until_ready(
        mlm_head(x, weight, bias, out_dtype=jnp.float32,
                 compute_dtype=jnp.float32))
    assert out.shape == (B, S - 1, V), out.shape
    assert jnp.allclose(out, ref, atol=2e-5, rtol=2e-5), \
        float(jnp.max(jnp.abs(out - ref)))

    # 2) Non-divisible rows / vocab exercise both padding paths.
    B2, S2, V2 = 3, 6, 200
    x2 = jax.random.normal(kx, (B2, S2, E), dtype=jnp.float32)
    w2 = jax.random.uniform(kw, (V2, E), minval=-bound, maxval=bound,
                            dtype=jnp.float32)
    b2 = jax.random.uniform(kb, (V2,), minval=-bound, maxval=bound,
                            dtype=jnp.float32)
    out2 = jax.block_until_ready(
        mlm_head(x2, w2, b2, out_dtype=jnp.float32, compute_dtype=jnp.float32))
    ref2 = mlm_head_ref(x2, w2, b2)
    assert out2.shape == (B2, S2 - 1, V2), out2.shape
    assert jnp.allclose(out2, ref2, atol=2e-5, rtol=2e-5), \
        float(jnp.max(jnp.abs(out2 - ref2)))

    # 3) Single-buffered output block (the v7x / tight-VMEM configuration).
    out1b = jax.block_until_ready(
        mlm_head(x, weight, bias, out_dtype=jnp.float32,
                 compute_dtype=jnp.float32, out_buffers=1))
    assert jnp.allclose(out1b, ref, atol=2e-5, rtol=2e-5), \
        float(jnp.max(jnp.abs(out1b - ref)))

    # 4) Default fast path: bf16 MXU inputs, f32 accumulation, bf16 log-probs.
    out_bf16 = jax.block_until_ready(mlm_head(x, weight, bias))
    assert out_bf16.dtype == jnp.bfloat16
    assert jnp.allclose(out_bf16.astype(jnp.float32), ref, atol=0.2, rtol=0.05), \
        float(jnp.max(jnp.abs(out_bf16.astype(jnp.float32) - ref)))

    print("KERNEL_OK")
</pallas_src>

<mosaic_0001>
module attributes {stable_mosaic.version = 11 : i64} {
  func.func @_mlm_head_kernel(%arg0: i32, %arg1: i32, %arg2: memref<8x32xf32, #tpu.memory_space<vmem>>, %arg3: memref<32x128xf32, #tpu.memory_space<vmem>>, %arg4: memref<1x128xf32, #tpu.memory_space<vmem>>, %arg5: memref<8x128xf32, #tpu.memory_space<vmem>>, %arg6: memref<8x1xf32, #tpu.memory_space<vmem>>, %arg7: memref<8x1xf32, #tpu.memory_space<vmem>>) attributes {dimension_semantics = [#tpu.dimension_semantics<parallel>, #tpu.dimension_semantics<arbitrary>], iteration_bounds = array<i64: 2, 1>, scalar_prefetch = 0 : i64, scratch_operands = 2 : i64, tpu.core_type = #tpu.core_type<tc>, window_params = [{transform_indices = @transform_0, window_bounds = array<i64: 8, 32>}, {transform_indices = @transform_1, window_bounds = array<i64: 32, 128>}, {transform_indices = @transform_2, window_bounds = array<i64: 1, 128>}, {transform_indices = @transform_3, window_bounds = array<i64: 8, 128>}]} {
    %c0_i32 = arith.constant 0 : i32
    %0 = arith.cmpi eq, %arg1, %c0_i32 : i32
    %1 = arith.extui %0 : i1 to i32
    %c0_i32_0 = arith.constant 0 : i32
    %2 = arith.cmpi ne, %1, %c0_i32_0 : i32
    scf.if %2 {
      %cst_19 = arith.constant 0xFF800000 : f32
      %32 = vector.broadcast %cst_19 : f32 to vector<8x1xf32>
      %c0_20 = arith.constant 0 : index
      %c0_21 = arith.constant 0 : index
      %33 = vector.load %arg6[%c0_20, %c0_21] : memref<8x1xf32, #tpu.memory_space<vmem>>, vector<8x1xf32>
      tpu.vector_store %arg6[%c0_20, %c0_21], %32 {strides = array<i32>} : memref<8x1xf32, #tpu.memory_space<vmem>>, vector<8x1xf32>,
      %cst_22 = arith.constant 0.000000e+00 : f32
      %34 = vector.broadcast %cst_22 : f32 to vector<8x1xf32>
      %c0_23 = arith.constant 0 : index
      %c0_24 = arith.constant 0 : index
      %35 = vector.load %arg7[%c0_23, %c0_24] : memref<8x1xf32, #tpu.memory_space<vmem>>, vector<8x1xf32>
      tpu.vector_store %arg7[%c0_23, %c0_24], %34 {strides = array<i32>} : memref<8x1xf32, #tpu.memory_space<vmem>>, vector<8x1xf32>,
    } else {
    }
    %c0 = arith.constant 0 : index
    %c0_1 = arith.constant 0 : index
    %3 = vector.load %arg2[%c0, %c0_1] : memref<8x32xf32, #tpu.memory_space<vmem>>, vector<8x32xf32>
    %c0_2 = arith.constant 0 : index
    %c0_3 = arith.constant 0 : index
    %4 = vector.load %arg3[%c0_2, %c0_3] : memref<32x128xf32, #tpu.memory_space<vmem>>, vector<32x128xf32>
    %cst = arith.constant dense<0.000000e+00> : vector<8x128xf32>
    %5 = tpu.matmul %3, %4, %cst {dimension_numbers = #tpu.dot_dimension_numbers<[1], [0], [0], [1], [0, 0, 1, 1], [], []>} : vector<8x32xf32>, vector<32x128xf32>, vector<8x128xf32> -> vector<8x128xf32>
    %c0_4 = arith.constant 0 : index
    %c0_5 = arith.constant 0 : index
    %6 = vector.load %arg4[%c0_4, %c0_5] : memref<1x128xf32, #tpu.memory_space<vmem>>, vector<1x128xf32>
    %7 = vector.broadcast %6 : vector<1x128xf32> to vector<8x128xf32>
    %8 = arith.addf %5, %7 : vector<8x128xf32>
    %c0_6 = arith.constant 0 : index
    %c0_7 = arith.constant 0 : index
    %9 = vector.load %arg6[%c0_6, %c0_7] : memref<8x1xf32, #tpu.memory_space<vmem>>, vector<8x1xf32>
    %cst_8 = arith.constant dense<0xFF800000> : vector<8xf32>
    %10 = vector.multi_reduction <maximumf>, %8, %cst_8 [1] : vector<8x128xf32> to vector<8xf32>
    %11 = vector.shape_cast %10 : vector<8xf32> to vector<8x1xf32>
    %12 = arith.maximumf %9, %11 : vector<8x1xf32>
    %13 = arith.subf %9, %12 : vector<8x1xf32>
    %14 = math.exp %13 : vector<8x1xf32>
    %c0_9 = arith.constant 0 : index
    %c0_10 = arith.constant 0 : index
    %15 = vector.load %arg7[%c0_9, %c0_10] : memref<8x1xf32, #tpu.memory_space<vmem>>, vector<8x1xf32>
    %16 = arith.mulf %14, %15 : vector<8x1xf32>
    %17 = vector.broadcast %12 : vector<8x1xf32> to vector<8x128xf32>
    %18 = arith.subf %8, %17 : vector<8x128xf32>
    %19 = math.exp %18 : vector<8x128xf32>
    %cst_11 = arith.constant dense<0.000000e+00> : vector<8xf32>
    %20 = vector.multi_reduction <add>, %19, %cst_11 [1] : vector<8x128xf32> to vector<8xf32>
    %21 = vector.shape_cast %20 : vector<8xf32> to vector<8x1xf32>
    %22 = arith.addf %16, %21 : vector<8x1xf32>
    %c0_12 = arith.constant 0 : index
    %c0_13 = arith.constant 0 : index
    %23 = vector.load %arg7[%c0_12, %c0_13] : memref<8x1xf32, #tpu.memory_space<vmem>>, vector<8x1xf32>
    tpu.vector_store %arg7[%c0_12, %c0_13], %22 {strides = array<i32>} : memref<8x1xf32, #tpu.memory_space<vmem>>, vector<8x1xf32>,
    %c0_14 = arith.constant 0 : index
    %c0_15 = arith.constant 0 : index
    %24 = vector.load %arg6[%c0_14, %c0_15] : memref<8x1xf32, #tpu.memory_space<vmem>>, vector<8x1xf32>
    tpu.vector_store %arg6[%c0_14, %c0_15], %12 {strides = array<i32>} : memref<8x1xf32, #tpu.memory_space<vmem>>, vector<8x1xf32>,
    %c128_i32 = arith.constant 128 : i32
    %25 = arith.muli %arg1, %c128_i32 : i32
    %26 = tpu.assume_multiple %25, 128 : i32
    %c0_16 = arith.constant 0 : index
    %27 = arith.index_cast %26 : i32 to index
    %28 = vector.load %arg5[%c0_16, %27] : memref<8x128xf32, #tpu.memory_space<vmem>>, vector<8x128xf32>
    tpu.vector_store %arg5[%c0_16, %27], %8 {strides = array<i32>} : memref<8x128xf32, #tpu.memory_space<vmem>>, vector<8x128xf32>,
    %c0_i32_17 = arith.constant 0 : i32
    %29 = arith.cmpi eq, %arg1, %c0_i32_17 : i32
    %30 = arith.extui %29 : i1 to i32
    %c0_i32_18 = arith.constant 0 : i32
    %31 = arith.cmpi ne, %30, %c0_i32_18 : i32
    scf.if %31 {
      %c0_19 = arith.constant 0 : index
      %c0_20 = arith.constant 0 : index
      %32 = vector.load %arg6[%c0_19, %c0_20] : memref<8x1xf32, #tpu.memory_space<vmem>>, vector<8x1xf32>
      %c0_21 = arith.constant 0 : index
      %c0_22 = arith.constant 0 : index
      %33 = vector.load %arg7[%c0_21, %c0_22] : memref<8x1xf32, #tpu.memory_space<vmem>>, vector<8x1xf32>
      %34 = math.log %33 : vector<8x1xf32>
      %35 = arith.addf %32, %34 : vector<8x1xf32>
      %c0_23 = arith.constant 0 : index
      %c0_24 = arith.constant 0 : index
      %36 = vector.load %arg5[%c0_23, %c0_24] : memref<8x128xf32, #tpu.memory_space<vmem>>, vector<8x128xf32>
      %37 = vector.broadcast %35 : vector<8x1xf32> to vector<8x128xf32>
      %38 = arith.subf %36, %37 : vector<8x128xf32>
      %c0_25 = arith.constant 0 : index
      %c0_26 = arith.constant 0 : index
      %39 = vector.load %arg5[%c0_25, %c0_26] : memref<8x128xf32, #tpu.memory_space<vmem>>, vector<8x128xf32>
      tpu.vector_store %arg5[%c0_25, %c0_26], %38 {strides = array<i32>} : memref<8x128xf32, #tpu.memory_space<vmem>>, vector<8x128xf32>,
    } else {
    }
    return
  }
  func.func @transform_0(%arg0: i32, %arg1: i32) -> (i32, i32) {
    %c0_i32 = arith.constant 0 : i32
    %c0_i32_0 = arith.constant 0 : i32
    return %arg0, %c0_i32 : i32, i32
  }
  func.func @transform_1(%arg0: i32, %arg1: i32) -> (i32, i32) {
    %c0_i32 = arith.constant 0 : i32
    %c0_i32_0 = arith.constant 0 : i32
    return %c0_i32, %arg1 : i32, i32
  }
  func.func @transform_2(%arg0: i32, %arg1: i32) -> (i32, i32) {
    %c0_i32 = arith.constant 0 : i32
    %c0_i32_0 = arith.constant 0 : i32
    return %c0_i32, %arg1 : i32, i32
  }
  func.func @transform_3(%arg0: i32, %arg1: i32) -> (i32, i32) {
    %c0_i32 = arith.constant 0 : i32
    %c0_i32_0 = arith.constant 0 : i32
    return %arg0, %c0_i32 : i32, i32
  }
}

</mosaic_0001>

<bundles_post_ra>
// kernel: tpu_custom_call.1
= control target key start
LH: loop header
LB: loop body
LE: loop exit
PB: predicated region body
PF: predicated region fallthrough
CT: control target
= control target key end

     0   :  { %8 = vsyncpa [#allocation5], 0  ;;  %s1017_s0 = inlined_call_operand.hbm [shape: f32[16,32], index: 0, kind: input, shape index: {}]   ;;  %s1018_s1 = inlined_call_operand.hbm [shape: f32[32,128], index: 1, kind: input, shape index: {}]   ;;  %s1019_s2 = inlined_call_operand.vmem [shape: f32[1,128], index: 2, kind: input, shape index: {}]   ;;  %s1020_s3 = inlined_call_operand.hbm [shape: f32[16,128], index: 3, kind: output, shape index: {}]  }
   0x1   :  { %10 = vsyncpa [#allocation5 + $0x1], 0 }
   0x2   :  { %11 = vsyncpa [#allocation8], 0 }
   0x3   :  { %12 = vsyncpa [#allocation6], 0 }
   0x4   :  { %14 = vsyncpa [#allocation6 + $0x1], 0  ;;  %s792_s12 = smov 0   ;;  %s794_s13 = smov 0  }
   0x5   :  { %s796_s14 = smov 0   ;;  %s798_s15 = smov 0  }
   0x6   :  { %s800_s16 = smov 0   ;;  %s802_s17 = smov 0  }
   0x7 LB: > { %s488_s18 = sadd.s32 4294967295, %s760_s17   ;;  %s489_s19 = sadd.s32 4294967294, %s760_s17   ;;  %s760_s17 = sphi %s802_s17, %s20_s17   ;;  %s756_s16 = sphi %s800_s16, %s1044_s16   ;;  %s752_s15 = sphi %s798_s15, %s1043_s15   ;;  %s748_s14 = sphi %s796_s14, %s1042_s14   ;;  %s744_s13 = sphi %s794_s13, %s1041_s13   ;;  %s740_s12 = sphi %s792_s12, %s1040_s12  }
   0x8   : > { %p52_p0 = scmp.ne.s32.totalorder %s744_s13, %s740_s12  ;;  %p826_p1 = scmp.eq.s32.totalorder %s488_s18, 0 }
   0x9   : > { %p830_p2 = scmp.eq.s32.totalorder %s488_s18, 1  ;;  %p134_p3 = scmp.eq.s32.totalorder %s489_s19, 1 }
   0xa   : > { %s1025_s20 = scalar_select %p826_p1, 1, 0 }
   0xb   : > { %s1026_s21 = scalar_select %p830_p2, 1, 0 }
   0xc   : > { %p836_p4 = por %p826_p1, %p52_p0  ;;  %p490_p5 = scmp.ge.s32.totalorder %s760_s17, 1 }
   0xd   : > { %p841_p6 = por %p134_p3, %p52_p0  ;;  %p141_p7 = scmp.lt.s32.totalorder %s760_s17, 3 }
   0xe   : > { %s1027_s22 = scalar_select %p836_p4, 1, 0 }
   0xf   : > { %s1028_s23 = scalar_select %p841_p6, 1, 0 }
  0x10   : > { %p846_p8 = pnand %p490_p5, %p141_p7  ;;  %s762_s25 = smov [#allocation7]  }
  0x11   : > { %s155_s26 = sshll.u32 %s762_s25, 4  ;;  %s32_s28 = sadd.s32 1, %s756_s16  ;;  %s156_s26 = int_to_ptr.vmem [resolvable:$true] %s155_s26 }
  0x12   : > { %s1029_s24 = scalar_select %p846_p8, 1, 0 }
  0x13   : > { %p536_p9 = pneg %p846_p8  ;;  %s616_s4 = scalar_lea.hbm %s1018_s1, 512 }
  0x14   : > { %p617_p12 = scmp.ne.s32.totalorder %s1018_s1, %s616_s4  ;;  %p623_p5 = scmp.lt.u32.totalorder %s616_s4, %s1018_s1 }
  0x15   : > { %p855_p11 = pnand %p536_p9, %p826_p1 }
  0x17   : > { %p618_p13 = pneg %p855_p11 }
  0x19   : > { %p619_p0 = pnand %p618_p13, %p617_p12 }
  0x1b   : > { %p620_p3 = pneg %p619_p0 }
  0x1d   : > { %p625_p7 = pnand %p623_p5, %p620_p3 }
  0x1f   : > { %628 = shalt.err (!%p625_p7)
}
  0x20   : > { %s629_s9 = scalar_lea.vmem %s156_s26, 512  ;;  %p637_p1 = scmp.lt.s32.totalorder %s156_s26, %s156_s26 }
  0x21   : > { %p630_p9 = scmp.ne.s32.totalorder %s156_s26, %s629_s9  ;;  %p638_p4 = scmp.lt.s32.totalorder %s629_s9, %s629_s9 }
  0x23   : > { %p632_p10 = pnand %p630_p9, %p618_p13  ;;  %p639_p8 = por %p638_p4, %p637_p1 }
  0x25   : > { %p633_p6 = pneg %p632_p10 }
  0x27   : > { %p640_p2 = pnand %p639_p8, %p633_p6 }
  0x29   : > { %643 = shalt.err (!%p640_p2)
}
  0x2a   : > { %s763_s10 = smov 128   ;;  %s764_s11 = smov 8  }
  0x2b   : > { %539 = dma.hbm_to_vmem [thread:$0]  (!%p855_p11), %s1018_s1, 512, %s156_s26, [#allocation8], %s763_s10, %s763_s10, %s764_s11  }
  0x2c   : > { %p34_p1 = scmp.ge.s32.totalorder %s32_s28, 2  ;;  %s39_s25 = sadd.s32 1, %s748_s14 }
  0x2d   : > { %p46_p2 = scmp.ne.s32.totalorder %s748_s14, %s744_s13  ;;  %p47_p4 = scmp.eq.s32.totalorder %s760_s17, 0 }
  0x2e   : > { %s1046_s28 = smov (%p34_p1, %s32_s28), 0  ;;  %p1032_p8 = scmp.ne.s32.totalorder %s1026_s21, 0 }
  0x2f   : > { %p882_p6 = por %p47_p4, %p46_p2  ;;  %s36_s27 = ssub.s32 %s756_s16, %s1046_s28 }
  0x30   : > { %p888_p10 = por %p1032_p8, %p46_p2  ;;  %p549_p12 = scmp.lt.s32.totalorder %s760_s17, 2 }
  0x31   : > { %p37_p11 = scmp.eq.s32.totalorder %s36_s27, 0  ;;  %s175_s26 = sand.u32 1, %s748_s14  }
  0x32   : > { %s494_s4 = sshll.u32 %s175_s26, 3  ;;  %s495_s6 = sshll.u32 %s756_s16, 7 }
  0x33   : > { %s897_s5 = scalar_select %p37_p11, %s748_s14, %s39_s25  }
  0x34   : > { %s903_s9 = scalar_lea.hbm %s1017_s0, %s495_s6  ;;  %s179_s21 = scalar_lea.vmem [#allocation4], %s494_s4 }
  0x35   : > { %s186_s10 = sshll.u32 %s179_s21, 4  ;;  %p909_p13 = pnand %p549_p12, %p882_p6  ;;  %s905_s10 = int_to_ptr.vmem [resolvable:$true] %s186_s10 }
  0x36   : > { %s176_s18 = scalar_lea.sflag [#allocation5], %s175_s26  ;;  %s644_s19 = scalar_lea.hbm %s903_s9, 128 }
  0x37   : > { %p645_p0 = scmp.ne.s32.totalorder %s903_s9, %s644_s19  ;;  %p646_p3 = pneg %p909_p13 }
  0x38   : > { %s649_s4 = scalar_lea.hbm %s1017_s0, 256  ;;  %p650_p9 = scmp.lt.u32.totalorder %s903_s9, %s1017_s0 }
  0x39   : > { %p647_p5 = pnand %p646_p3, %p645_p0  ;;  %p651_p1 = scmp.lt.u32.totalorder %s649_s4, %s644_s19 }
  0x3a   : > { %p653_p4 = scmp.lt.u32.totalorder %s644_s19, %s903_s9 }
  0x3b   : > { %p648_p7 = pneg %p647_p5  ;;  %p652_p2 = por %p651_p1, %p650_p9 }
  0x3d   : > { %p654_p6 = por %p653_p4, %p652_p2 }
  0x3f   : > { %p655_p8 = pnand %p654_p6, %p648_p7 }
  0x41   : > { %658 = shalt.err (!%p655_p8)
}
  0x42   : > { %s659_s26 = scalar_lea.vmem %s905_s10, 128  ;;  %s765_s7 = smov [#allocation4]  }
  0x43   : > { %p660_p12 = scmp.ne.s32.totalorder %s905_s10, %s659_s26  ;;  %s664_s8 = sshll.u32 %s765_s7, 4  ;;  %s665_s8 = int_to_ptr.vmem [resolvable:$false] %s664_s8 }
  0x44   : > { %s666_s21 = scalar_lea.vmem %s665_s8, 256  ;;  %p667_p5 = scmp.lt.s32.totalorder %s905_s10, %s665_s8 }
  0x45   : > { %p662_p11 = pnand %p660_p12, %p646_p3  ;;  %p668_p9 = scmp.lt.s32.totalorder %s666_s21, %s659_s26 }
  0x47   : > { %p663_p0 = pneg %p662_p11  ;;  %p669_p1 = por %p668_p9, %p667_p5 }
  0x49   : > { %p670_p2 = pnand %p669_p1, %p663_p0 }
  0x4b   : > { %673 = shalt.err (!%p670_p2)
}
  0x4c   : > { %543 = dma.hbm_to_vmem [thread:$0]  (!%p909_p13), %s903_s9, 128, %s905_s10, %s176_s18  }
  0x4d   : > { %p1035_p7 = scmp.ne.s32.totalorder %s1029_s24, 0 }
  0x4e   : > { %s941_s19 = sand.u32 (!%p1035_p7), 1, %s744_s13   ;;  %p1036_p3 = scmp.ne.s32.totalorder (!%p1035_p7), %s1027_s22, 0 }
  0x4f   : > { %195 = sbr.rel (%p1035_p7) target bundleno = 913 (0x391), region = 32  ;;  %s497_s25 = sshll.u32 (!%p1035_p7), %s941_s19, 3 }
  0x50   : > { %s198_s27 = scalar_lea.sflag (!%p1035_p7), [#allocation5], %s941_s19  ;;  %s201_s4 = scalar_lea.vmem (!%p1035_p7), [#allocation4], %s497_s25 }
  0x56   : > { %727 = dma.done.wait (%p1036_p3), %s198_s27, 128  }
  0x57   : > { %729 = vsyncadd (%p1036_p3), %s198_s27, 4294967168  ;;  %p1037_p13 = scmp.ne.s32.totalorder %s1025_s20, 0 }
  0x59   : > { %731 = dma.done.wait (%p1037_p13), [#allocation8], 512  }
  0x5a   : > { %733 = vsyncadd (%p1037_p13), [#allocation8], 4294966784  ;;  %vm238_vm0 = vcmask 7168   ;;  %v766_v0 = vmov 0.0|0.0   ;;  %v767_v1 = vmov -inf   ;;  %v768_v2 = vmov 0.0  }
  0x5b   : > { %522 = vmatprep.subr.bf16.mxu0 %v766_v0  ;;  %239 = vst.msk [vmem:[#allocation2] sm:$0xff] %vm238_vm0, %v767_v1  ;;  %240 = vst.msk [vmem:[#allocation3] sm:$0xff] %vm238_vm0, %v768_v2  ;;  %vm769_vm1 = vmmov 0   ;;  %v242_v3 = vld [vmem:[#allocation7] sm:$0xff]  ;;  %v243_v4 = vld [vmem:[#allocation7 + $0x8] sm:$0xff]  ;;  %vm253_vm2 = vcmask 261120  }
  0x5c   : > { %519 = vmatprep.mubr.msk.f32.mxu0 %vm769_vm1, %v768_v2  ;;  %v244_v5 = vld [vmem:[#allocation7 + $0x10] sm:$0xff]  ;;  %v523_v6 = vpack.c.bf16 %v243_v4, %v242_v3  ;;  %v245_v7 = vld [vmem:[#allocation7 + $0x18] sm:$0xff]  ;;  %v500_v10 = vld [vmem:[%s1019_s2] ss:$0 sm:$0xff]  ;;  %v770_v14 = vmov 0   ;;  %s503_s24 = sshll.u32 %s752_s15, 7 }
  0x5d   : > { %v526_v8 = vpack.c.bf16 %v245_v7, %v244_v5  ;;  %v241_v9 = vld [vmem:[%s201_s4] sm:$0xff]  ;;  %608 = vset.pattern.permute.xlu0 %v770_v14  ;;  %609 = vset.pattern.permute.xlu1 %v770_v14  ;;  %s230_s9 = scalar_lea.vmem [#allocation9], %s497_s25  ;;  %s968_s29 = scalar_lea.hbm %s1020_s3, %s503_s24 }
  0x5e   : > { %524 = vmatpush3.bf16.msra.mxu0 %v523_v6  ;;  %s385_s10 = sshll.u32 %s230_s9, 4  ;;  %s372_s6 = scalar_lea.sflag [#allocation6], %s941_s19  ;;  %s970_s10 = int_to_ptr.vmem [resolvable:$true] %s385_s10 }
  0x5f   : > { %525 = vmatprep.subr.bf16.mxu0 %v766_v0  ;;  %s674_s26 = scalar_lea.vmem %s970_s10, 128  ;;  %s771_s15 = smov [#allocation9]  }
  0x60   : > { %p675_p4 = scmp.ne.s32.totalorder %s970_s10, %s674_s26  ;;  %s678_s7 = sshll.u32 %s771_s15, 4  ;;  %s679_s7 = int_to_ptr.vmem [resolvable:$false] %s678_s7 }
  0x61   : > { %s680_s8 = scalar_lea.vmem %s679_s7, 256  ;;  %p681_p12 = scmp.lt.s32.totalorder %s970_s10, %s679_s7 }
  0x62   : > { %527 = vmatpush3.bf16.msra.mxu0 %v526_v8  ;;  %v327_v15 = vld [vmem:[#allocation2] sm:$0xff]  ;;  %v334_v25 = vld [vmem:[#allocation3] sm:$0xff]  ;;  %p676_p6 = pnand %p675_p4, %p888_p10  ;;  %p682_p11 = scmp.lt.s32.totalorder %s680_s8, %s674_s26 }
  0x64   : > { %p677_p8 = pneg %p676_p6  ;;  %p683_p0 = por %p682_p11, %p681_p12 }
  0x65   : > { %520 = vmatmul.mubr.msk.f32.vlgmr.msra.gmra.mrb[0].mxu0 %vm253_vm2, %v241_v9 }
  0x66   : > { %p684_p5 = pnand %p683_p0, %p677_p8 }
 0x138   : > { %v323_v11 = vpop.f32.mrb[0].mxu0 }
 0x139   : > { %v324_v12 = vadd.f32 %v500_v10, %v323_v11  ;;  %v521_v13 = vpop.f32.mrb[1].mxu0 }
 0x13b   : > { %328 = vmax.xlane.f32.xlu0 %v324_v12 }
 0x1c8   : > { %v329_v16 = vpop.xlane.xlu0 %328 }
 0x1c9   : > { %v330_v17 = vmax.f32 %v327_v15, %v329_v16 }
 0x1cb   : > { %v331_v18 = vsub.f32 %v327_v15, %v330_v17  ;;  %349 = vst.msk [vmem:[#allocation2] sm:$0xff] %vm238_vm0, %v330_v17  ;;  %338 = vperm.xlu0 %608, %v330_v17  }
 0x1cd   : > { %v332_v23 = vmul.f32 1.442695, %v331_v18 }
 0x1d2   : > { %v358_v32 = vld [vmem:[#allocation2] sm:$0xff] }
 0x24a   : > { %v339_v19 = vpop.permute.xlu0 %338 }
 0x24b   : > { %v341_v20 = vsub.f32 %v324_v12, %v339_v19 }
 0x24d   : > { %v342_v21 = vmul.f32 1.442695, %v341_v20 }
 0x24f   : > { %610 = vpow2.f32 %v342_v21 }
 0x250   : > { %612 = vpow2.f32 %v332_v23 }
 0x259   : > { %v611_v22 = vpop.eup %610 }
 0x25a   : > { %344 = vadd.xlane.f32.xlu1 %v611_v22  ;;  %v613_v24 = vpop.eup %612 }
 0x25b   : > { %v335_v26 = vmul.f32 %v613_v24, %v334_v25 }
 0x2e7   : > { %v345_v27 = vpop.xlane.xlu1 %344 }
 0x2e8   : > { %v346_v28 = vadd.f32 %v345_v27, %v335_v26 }
 0x2ea   : > { %348 = vst.msk [vmem:[#allocation3] sm:$0xff] %vm238_vm0, %v346_v28 }
 0x2f1   : > { %v359_v29 = vld [vmem:[#allocation3] sm:$0xff] }
 0x2f2   : > { %614 = vlog2.f32 %v359_v29 }
 0x2fc   : > { %v615_v30 = vpop.eup %614 }
 0x2fd   : > { %v361_v31 = vmul.f32 0.6931472, %v615_v30 }
 0x2ff   : > { %v362_v33 = vadd.f32 %v361_v31, %v358_v32 }
 0x301   : > { %366 = vperm.xlu1 %609, %v362_v33  }
 0x380   : > { %v367_v34 = vpop.permute.xlu1 %366 }
 0x381   : > { %v369_v35 = vsub.f32 %v324_v12, %v367_v34 }
 0x383   : > { %370 = vst [vmem:[%s230_s9] sm:$0xff] %v369_v35 }
 0x384   : > { %687 = shalt.err (!%p684_p5)
}
 0x385   : > { %s688_s21 = scalar_lea.hbm %s968_s29, 128  ;;  %s692_s27 = scalar_lea.hbm %s1020_s3, 256 }
 0x386   : > { %p689_p9 = scmp.ne.s32.totalorder %s968_s29, %s688_s21  ;;  %p693_p7 = scmp.lt.u32.totalorder %s968_s29, %s1020_s3 }
 0x387   : > { %p694_p3 = scmp.lt.u32.totalorder %s692_s27, %s688_s21  ;;  %p696_p4 = scmp.lt.u32.totalorder %s688_s21, %s968_s29 }
 0x388   : > { %p690_p1 = pnand %p689_p9, %p888_p10 }
 0x389   : > { %p695_p13 = por %p694_p3, %p693_p7 }
 0x38a   : > { %p691_p2 = pneg %p690_p1 }
 0x38b   : > { %p697_p6 = por %p696_p4, %p695_p13 }
 0x38d   : > { %p698_p8 = pnand %p697_p6, %p691_p2 }
 0x38f   : > { %701 = shalt.err (!%p698_p8)
}
 0x390   : > { %534 = dma.vmem_to_hbm [thread:$0]  (%p888_p10), %s970_s10, 128, %s968_s29, %s372_s6  }
 0x391 PF: > { %s397_s22 = sand.u32 1, %s740_s12   ;;  %p1038_p12 = scmp.ne.s32.totalorder %s1028_s23, 0 }
 0x392   : > { %p1039_p11 = scmp.ge.s32.totalorder %s760_s17, 2  ;;  %s398_s24 = scalar_lea.sflag [#allocation6], %s397_s22 }
 0x394   : > { %p545_p0 = pnand %p1039_p11, %p1038_p12 }
 0x396   : > { %735 = dma.done.wait (!%p545_p0), %s398_s24, 128  }
 0x397   : > { %737 = vsyncadd (!%p545_p0), %s398_s24, 4294967168  ;;  %s20_s17 = sadd.s32 1, %s760_s17   ;;  %s1040_s12 = smov %s744_s13 }
 0x398   : > { %p17_p5 = scmp.ge.s32.totalorder %s20_s17, 4   ;;  %s1041_s13 = smov %s748_s14 }
 0x399   : > { %s1042_s14 = smov %s897_s5  ;;  %s1043_s15 = smov %s756_s16 }
 0x39a   : > { %s1044_s16 = smov %s1046_s28  ;;  %19 = sbr.rel (!%p17_p5) target bundleno = 7 (0x7), region = 94 }
 0x3a1   :  { %403 = vsyncpa [#allocation5], 1 }
 0x3a2   :  { %405 = vsyncpa [#allocation5 + $0x1], 1 }
 0x3a3   :  { %406 = vsyncpa [#allocation8], 1 }
 0x3a4   :  { %407 = vsyncpa [#allocation6], 1 }
 0x3a5   :  { %409 = vsyncpa [#allocation6 + $0x1], 1 }

</bundles_post_ra>
